<compile_context>
chip_gen: v5e
topology: v5e:2x2
jax: 0.10.0
libtpu: 0.0.40
codegen_flags: <defaults>
</compile_context>

<pallas_src>
import functools

import jax
import jax.numpy as jnp
from jax.experimental import pallas as pl
from jax.experimental.pallas import tpu as pltpu


def _qleaky_kernel(ws_ref, x_ref, o_ref, *, alpha, beta, adpt_en,
                   quantization_mode, aware_mode):
    if quantization_mode:
        # _quantize(): alpha -> round(alpha*256)/256 (static),
        #              beta  -> round(beta * weight_scale) (runtime scalar, SMEM)
        ws = ws_ref[0].astype(jnp.float32)
        alpha_q = round(alpha * 256.0) / 256.0
        beta_q = jnp.round(jnp.float32(beta) * ws)
        xf = x_ref[...].astype(jnp.float32)
        if adpt_en:
            out = jnp.floor(jnp.float32(alpha_q) * xf) + beta_q
        else:
            out = xf + beta_q
        out = jnp.clip(out, -134217728.0, 134217727.0)
        o_ref[...] = out.astype(o_ref.dtype)
    elif aware_mode and adpt_en:
        # DifferentiableFloor forward == floor. Hoist scalar reciprocal: one
        # scalar divide + a vector multiply instead of a per-element divide.
        ws = ws_ref[0].astype(jnp.float32)
        inv_ws = 1.0 / ws
        xf = x_ref[...].astype(jnp.float32)
        out = jnp.floor(jnp.float32(alpha) * xf * ws) * inv_ws + jnp.float32(beta)
        o_ref[...] = out.astype(o_ref.dtype)
    else:
        # Plain path: compute in the native dtype (no f32 up-cast; bf16 VPU on
        # v6e/v7x handles this directly, and for f32 inputs it is identical).
        x = x_ref[...]
        dt = x.dtype
        if adpt_en:
            out = x * jnp.asarray(alpha, dtype=dt) + jnp.asarray(beta, dtype=dt)
        else:
            out = x + jnp.asarray(beta, dtype=dt)
        o_ref[...] = out.astype(o_ref.dtype)


def qleaky_forward(x, weight_scale, *, alpha, beta, adpt_en=True,
                   quantization_mode=False, aware_mode=False):
    """Pallas implementation of QLeaky.forward(x, weight_scale)."""
    assert alpha <= 1
    assert not (quantization_mode and aware_mode), \
        "Quantization mode and QAT mode are mutual exclusive"

    orig_shape = x.shape
    orig_dtype = x.dtype
    total = x.size

    # Lane-dense slab: pad to a multiple of 1024 lanes, reshape to (rows, 1024).
    COLS = 1024
    padded = pl.cdiv(total, COLS) * COLS
    flat = x.reshape(-1)
    if padded != total:
        flat = jnp.pad(flat, (0, padded - total))
    rows = padded // COLS
    x2d = flat.reshape(rows, COLS)

    # Block of (256, 1024) f32 = 1 MiB per buffer; with in+out double-buffered
    # this stays far under the smallest (v5e, 16 MiB) scoped-VMEM default.
    TILE_R = 256 if rows >= 256 else rows
    grid = (pl.cdiv(rows, TILE_R),)

    ws = jnp.asarray(weight_scale, dtype=jnp.float32).reshape(1)

    kernel = functools.partial(
        _qleaky_kernel,
        alpha=float(alpha),
        beta=float(beta),
        adpt_en=adpt_en,
        quantization_mode=quantization_mode,
        aware_mode=aware_mode,
    )

    itemsize = jnp.dtype(orig_dtype).itemsize
    out2d = pl.pallas_call(
        kernel,
        out_shape=jax.ShapeDtypeStruct(x2d.shape, orig_dtype),
        grid_spec=pltpu.PrefetchScalarGridSpec(
            num_scalar_prefetch=1,                      # ws -> SMEM
            grid=grid,
            in_specs=[pl.BlockSpec((TILE_R, COLS), lambda i, _ws: (i, 0))],
            out_specs=pl.BlockSpec((TILE_R, COLS), lambda i, _ws: (i, 0)),
        ),
        compiler_params=pltpu.CompilerParams(
            dimension_semantics=("parallel",)),         # shard rows across TCs (v7x)
        cost_estimate=pl.CostEstimate(
            flops=2 * padded,
            transcendentals=0,
            bytes_accessed=2 * padded * itemsize),      # read + write
    )(ws, x2d)

    out_flat = out2d.reshape(-1)
    if padded != total:
        out_flat = out_flat[:total]
    return out_flat.reshape(orig_shape)


if __name__ == "__main__":
    key = jax.random.PRNGKey(0)
    # Small NCHW activation, consistent with how Leaky is used in an SNN conv stack.
    x = jax.random.normal(key, (2, 4, 16, 16), dtype=jnp.float32) * 4.0
    weight_scale = jnp.float32(64.0)

    alpha, beta = 0.9, 0.1

    # 1) Plain (non-quantized, non-aware) forward: alpha * x + beta
    out_plain = qleaky_forward(x, weight_scale, alpha=alpha, beta=beta)
    jax.block_until_ready(out_plain)
    ref_plain = alpha * x + beta
    assert jnp.allclose(out_plain, ref_plain, atol=1e-5, rtol=1e-5)

    # 2) adpt_en=False forward: x + beta
    out_noad = qleaky_forward(x, weight_scale, alpha=alpha, beta=beta,
                              adpt_en=False)
    jax.block_until_ready(out_noad)
    assert jnp.allclose(out_noad, x + beta, atol=1e-5, rtol=1e-5)

    # 3) Quantization-mode forward: floor(alpha_q * x) + round(beta * ws), clamped
    out_q = qleaky_forward(x, weight_scale, alpha=alpha, beta=beta,
                           quantization_mode=True)
    jax.block_until_ready(out_q)
    alpha_q = round(alpha * 256.0) / 256.0
    beta_q = jnp.round(beta * weight_scale)
    ref_q = jnp.clip(jnp.floor(alpha_q * x) + beta_q, -134217728.0, 134217727.0)
    assert jnp.allclose(out_q, ref_q, atol=1e-5, rtol=1e-5)

    # 4) QAT-aware forward: floor(alpha * x * ws) / ws + beta
    out_a = qleaky_forward(x, weight_scale, alpha=alpha, beta=beta,
                           aware_mode=True)
    jax.block_until_ready(out_a)
    ref_a = jnp.floor(alpha * x * weight_scale) / weight_scale + beta
    assert jnp.allclose(out_a, ref_a, atol=1e-5, rtol=1e-5)

    # 5) Non-multiple-of-128 total (exercises pad + slice path), plain mode.
    x_odd = jax.random.normal(jax.random.PRNGKey(1), (2, 3, 17, 5),
                              dtype=jnp.float32)
    out_odd = qleaky_forward(x_odd, weight_scale, alpha=alpha, beta=beta)
    jax.block_until_ready(out_odd)
    assert jnp.allclose(out_odd, alpha * x_odd + beta, atol=1e-5, rtol=1e-5)

    print("KERNEL_OK")
</pallas_src>

<mosaic_0001>
module attributes {stable_mosaic.version = 11 : i64} {
  func.func @_qleaky_kernel(%arg0: i32, %arg1: memref<1xf32, #tpu.memory_space<smem>>, %arg2: memref<2x1024xf32, #tpu.memory_space<vmem>>, %arg3: memref<2x1024xf32, #tpu.memory_space<vmem>>) attributes {dimension_semantics = [#tpu.dimension_semantics<parallel>], iteration_bounds = array<i64: 1>, scalar_prefetch = 1 : i64, scratch_operands = 0 : i64, tpu.core_type = #tpu.core_type<tc>, window_params = [{transform_indices = @transform_0, window_bounds = array<i64: 2, 1024>}, {transform_indices = @transform_1, window_bounds = array<i64: 2, 1024>}]} {
    %c0 = arith.constant 0 : index
    %c0_0 = arith.constant 0 : index
    %0 = vector.load %arg2[%c0, %c0_0] : memref<2x1024xf32, #tpu.memory_space<vmem>>, vector<2x1024xf32>
    %cst = arith.constant 0.899999976 : f32
    %1 = vector.broadcast %cst : f32 to vector<2x1024xf32>
    %2 = arith.mulf %0, %1 : vector<2x1024xf32>
    %cst_1 = arith.constant 1.000000e-01 : f32
    %3 = vector.broadcast %cst_1 : f32 to vector<2x1024xf32>
    %4 = arith.addf %2, %3 : vector<2x1024xf32>
    %c0_2 = arith.constant 0 : index
    %c0_3 = arith.constant 0 : index
    %5 = vector.load %arg3[%c0_2, %c0_3] : memref<2x1024xf32, #tpu.memory_space<vmem>>, vector<2x1024xf32>
    tpu.vector_store %arg3[%c0_2, %c0_3], %4 {strides = array<i32>} : memref<2x1024xf32, #tpu.memory_space<vmem>>, vector<2x1024xf32>,
    return
  }
  func.func @transform_0(%arg0: i32, %arg1: memref<1xf32, #tpu.memory_space<smem>>) -> (i32, i32) {
    %c0_i32 = arith.constant 0 : i32
    %c0_i32_0 = arith.constant 0 : i32
    return %arg0, %c0_i32 : i32, i32
  }
  func.func @transform_1(%arg0: i32, %arg1: memref<1xf32, #tpu.memory_space<smem>>) -> (i32, i32) {
    %c0_i32 = arith.constant 0 : i32
    %c0_i32_0 = arith.constant 0 : i32
    return %arg0, %c0_i32 : i32, i32
  }
}

</mosaic_0001>

<bundles_post_ra>
// kernel: tpu_custom_call.1
= control target key start
LH: loop header
LB: loop body
LE: loop exit
PB: predicated region body
PF: predicated region fallthrough
CT: control target
= control target key end

     0   :  { %8 = vsyncpa [#allocation5], 0  ;;  %s127_s0 = inlined_call_operand.<no memory space> [shape: f32[1], index: 0, kind: input, shape index: {}]   ;;  %s128_s1 = inlined_call_operand.hbm [shape: f32[2,1024], index: 1, kind: input, shape index: {}]   ;;  %s129_s2 = inlined_call_operand.hbm [shape: f32[2,1024], index: 2, kind: output, shape index: {}]  }
   0x1   :  { %9 = vsyncpa [#allocation6], 0  ;;  %s15_s11 = sshll.u32 %s128_s1, 4  ;;  %s104_s12 = smov [#allocation4]   ;;  %s16_s11 = int_to_ptr.hbm [resolvable:$true] %s15_s11 }
   0x2   :  { %s17_s13 = sshll.u32 %s104_s12, 4  ;;  %s18_s13 = int_to_ptr.vmem [resolvable:$true] %s17_s13 }
   0x3   :  { %20 = dma.hbm_to_vmem [thread:$0]  %s16_s11, 256, %s18_s13, [#allocation5]  }
   0x4   :  { %100 = dma.done.wait [#allocation5], 256  }
   0x5   :  { %101 = vsyncadd [#allocation5], 4294967040  ;;  %v25_v0 = vld [vmem:[#allocation4] sm:$0xff]  ;;  %v26_v1 = vld [vmem:[#allocation4 + $0x8] sm:$0xff]  ;;  %s105_s0 = smov [#allocation7]   ;;  %s40_s17 = sshll.u32 %s129_s2, 4  ;;  %s41_s17 = int_to_ptr.hbm [resolvable:$true] %s40_s17 }
   0x6   :  { %v27_v2 = vmul.f32 0.9, %v25_v0  ;;  %v28_v3 = vmul.f32 0.9, %v26_v1  ;;  %s38_s14 = sshll.u32 %s105_s0, 4  ;;  %s39_s14 = int_to_ptr.vmem [resolvable:$true] %s38_s14 }
   0x8   :  { %v29_v4 = vadd.f32 0.1, %v27_v2  ;;  %v30_v5 = vadd.f32 0.1, %v28_v3 }
   0xa   :  { %31 = vst [vmem:[#allocation7] sm:$0xff] %v29_v4 }
   0xb   :  { %32 = vst [vmem:[#allocation7 + $0x8] sm:$0xff] %v30_v5 }
   0xc   :  { %43 = dma.vmem_to_hbm [thread:$0]  %s39_s14, 256, %s41_s17, [#allocation6]  }
   0xd   :  { %102 = dma.done.wait [#allocation6], 256  }
   0xe   :  { %103 = vsyncadd [#allocation6], 4294967040 }
   0xf   :  { %48 = vsyncpa [#allocation5], 1 }
  0x10   :  { %49 = vsyncpa [#allocation6], 1 }

</bundles_post_ra>
